<compile_context>
chip_gen: v7x
topology: tpu7x:2x2x1
jax: 0.10.0
libtpu: 0.0.40
codegen_flags: <defaults>
</compile_context>

<pallas_src>
import jax
import jax.numpy as jnp
from jax.experimental import pallas as pl
from jax.experimental.pallas import tpu as pltpu

LATENT_DIM = 32
HIDDEN_DIM = 64
OUTPUT_DIM = 30

HIDDEN_PAD = 128          # lane-dense hidden width (intermediate only, never hits HBM)
TARGET_TILE_B = 4096      # target rows per grid step (mem-bound sweet spot)
MIN_SPLIT_B = 256         # force >=2 grid steps (v7x dual-TC) above this batch size


def _round_up(x, m):
    return ((x + m - 1) // m) * m


def _cdiv(a, b):
    return -(-a // b)


def _decoder_kernel(z_ref, w1_ref, w2_ref, bias_ref, o_ref):
    # Cast f32 z to bf16 in-kernel (VALU has huge slack; avoids a wrapper pass).
    z = z_ref[...].astype(w1_ref.dtype)
    # Layer 1: bf16 MXU matmul, f32 accumulate; bias-add + ReLU on the VPU.
    # Padded hidden lanes [HIDDEN_DIM:HIDDEN_PAD) stay exactly 0 (zero weights/bias).
    h = jnp.dot(z, w1_ref[...], preferred_element_type=jnp.float32)
    h = jnp.maximum(h + bias_ref[0:1, :], 0.0)
    # Layer 2: bf16 MXU matmul straight to the 30 useful output lanes.
    out = jnp.dot(h.astype(w2_ref.dtype), w2_ref[...],
                  preferred_element_type=jnp.float32)
    out = out + bias_ref[1:2, 0:o_ref.shape[-1]]
    o_ref[...] = out.astype(o_ref.dtype)   # bf16, 30-lane (masked) store


def pack_params(w1, b1, w2, b2, compute_dtype=jnp.bfloat16):
    """One-time repack: pad hidden dim to 128 lanes, cast weights to bf16,
    stack both biases into a single (8, 128) f32 constants block (rows 0, 1)."""
    latent_dim, hidden_dim = w1.shape
    out_dim = w2.shape[1]
    w1p = jnp.zeros((latent_dim, HIDDEN_PAD), compute_dtype)
    w1p = w1p.at[:, :hidden_dim].set(w1.astype(compute_dtype))
    w2p = jnp.zeros((HIDDEN_PAD, out_dim), compute_dtype)
    w2p = w2p.at[:hidden_dim, :].set(w2.astype(compute_dtype))
    bias = jnp.zeros((8, 128), jnp.float32)
    bias = bias.at[0, :hidden_dim].set(b1.reshape(-1).astype(jnp.float32))
    bias = bias.at[1, :out_dim].set(b2.reshape(-1).astype(jnp.float32))
    return w1p, w2p, bias


def explanation_decoder(z, w1p, w2p, bias, *, target_tile_b=TARGET_TILE_B,
                        out_dtype=jnp.bfloat16):
    """z: (B, latent_dim) f32 -> (B, OUTPUT_DIM) bf16 (f32-accumulated)."""
    B, latent_dim = z.shape
    output_dim = w2p.shape[1]

    # Adaptive tiling: pad the batch only up to the next multiple of 8 per tile,
    # and guarantee >=2 grid steps when there's enough work (v7x dual TC).
    b_min = _round_up(B, 8)
    n_tiles = max(1, _cdiv(b_min, target_tile_b))
    if n_tiles == 1 and b_min >= MIN_SPLIT_B:
        n_tiles = 2
    tile_b = _round_up(_cdiv(b_min, n_tiles), 8)
    b_pad = tile_b * n_tiles

    zi = z if b_pad == B else jnp.pad(z, ((0, b_pad - B), (0, 0)))

    out = pl.pallas_call(
        _decoder_kernel,
        out_shape=jax.ShapeDtypeStruct((b_pad, output_dim), out_dtype),
        grid=(n_tiles,),
        in_specs=[
            pl.BlockSpec((tile_b, latent_dim), lambda i: (i, 0)),   # z tile (f32)
            pl.BlockSpec(w1p.shape, lambda i: (0, 0)),              # resident weights
            pl.BlockSpec(w2p.shape, lambda i: (0, 0)),
            pl.BlockSpec(bias.shape, lambda i: (0, 0)),             # packed biases
        ],
        out_specs=pl.BlockSpec((tile_b, output_dim), lambda i: (i, 0)),
        compiler_params=pltpu.CompilerParams(
            dimension_semantics=("parallel",)),
        cost_estimate=pl.CostEstimate(
            flops=2 * b_pad * (latent_dim * HIDDEN_PAD + HIDDEN_PAD * output_dim),
            transcendentals=0,
            bytes_accessed=(zi.size * zi.dtype.itemsize
                            + b_pad * output_dim * jnp.dtype(out_dtype).itemsize
                            + w1p.size * w1p.dtype.itemsize
                            + w2p.size * w2p.dtype.itemsize
                            + bias.size * bias.dtype.itemsize),
        ),
    )(zi, w1p, w2p, bias)
    return out if b_pad == B else out[:B]


def init_params(key, latent_dim=LATENT_DIM, hidden_dim=HIDDEN_DIM,
                output_dim=OUTPUT_DIM):
    """Deterministic synthetic init (matches PyTorch Linear's U(-1/sqrt(fan_in), +))."""
    k1, k2, k3, k4 = jax.random.split(key, 4)
    bound1 = 1.0 / jnp.sqrt(latent_dim)
    bound2 = 1.0 / jnp.sqrt(hidden_dim)
    w1 = jax.random.uniform(k1, (latent_dim, hidden_dim), jnp.float32, -bound1, bound1)
    b1 = jax.random.uniform(k2, (1, hidden_dim), jnp.float32, -bound1, bound1)
    w2 = jax.random.uniform(k3, (hidden_dim, output_dim), jnp.float32, -bound2, bound2)
    b2 = jax.random.uniform(k4, (1, output_dim), jnp.float32, -bound2, bound2)
    return w1, b1, w2, b2


def reference(z, w1, b1, w2, b2, compute_dtype=jnp.bfloat16):
    """Pure-JAX reference mimicking the kernel's bf16 casts (f32 accumulate)."""
    zc = z.astype(compute_dtype).astype(jnp.float32)
    w1c = w1.astype(compute_dtype).astype(jnp.float32)
    w2c = w2.astype(compute_dtype).astype(jnp.float32)
    h = jnp.maximum(zc @ w1c + b1, 0.0)
    h = h.astype(compute_dtype).astype(jnp.float32)
    return h @ w2c + b2


if __name__ == "__main__":
    key = jax.random.PRNGKey(0)
    kz, kp = jax.random.split(key)

    batch = 8
    z = jax.random.normal(kz, (batch, LATENT_DIM), jnp.float32)
    w1, b1, w2, b2 = init_params(kp)
    w1p, w2p, bias = pack_params(w1, b1, w2, b2)

    out = explanation_decoder(z, w1p, w2p, bias)
    out = jax.block_until_ready(out)

    ref = reference(z, w1, b1, w2, b2)
    assert out.shape == (batch, OUTPUT_DIM), out.shape
    assert out.dtype == jnp.bfloat16, out.dtype
    # Tolerance accounts for the bf16 output store on top of bf16 compute.
    assert jnp.allclose(out.astype(jnp.float32), ref, atol=3e-2, rtol=3e-2), \
        "mismatch vs reference"

    print("KERNEL_OK")
</pallas_src>

<mosaic_0001>
module attributes {stable_mosaic.version = 11 : i64} {
  func.func @_decoder_kernel(%arg0: i32, %arg1: memref<8x32xf32, #tpu.memory_space<vmem>>, %arg2: memref<32x128xbf16, #tpu.memory_space<vmem>>, %arg3: memref<128x30xbf16, #tpu.memory_space<vmem>>, %arg4: memref<8x128xf32, #tpu.memory_space<vmem>>, %arg5: memref<8x30xbf16, #tpu.memory_space<vmem>>) attributes {dimension_semantics = [#tpu.dimension_semantics<parallel>], iteration_bounds = array<i64: 1>, scalar_prefetch = 0 : i64, scratch_operands = 0 : i64, tpu.core_type = #tpu.core_type<tc>, window_params = [{transform_indices = @transform_0, window_bounds = array<i64: 8, 32>}, {pipeline_mode = #tpu.pipeline_mode<synchronous>, transform_indices = @transform_1, window_bounds = array<i64: 32, 128>}, {pipeline_mode = #tpu.pipeline_mode<synchronous>, transform_indices = @transform_2, window_bounds = array<i64: 128, 30>}, {pipeline_mode = #tpu.pipeline_mode<synchronous>, transform_indices = @transform_3, window_bounds = array<i64: 8, 128>}, {transform_indices = @transform_4, window_bounds = array<i64: 8, 30>}]} {
    %c0 = arith.constant 0 : index
    %c0_0 = arith.constant 0 : index
    %0 = vector.load %arg1[%c0, %c0_0] : memref<8x32xf32, #tpu.memory_space<vmem>>, vector<8x32xf32>
    %1 = arith.truncf %0 : vector<8x32xf32> to vector<8x32xbf16>
    %c0_1 = arith.constant 0 : index
    %c0_2 = arith.constant 0 : index
    %2 = vector.load %arg2[%c0_1, %c0_2] : memref<32x128xbf16, #tpu.memory_space<vmem>>, vector<32x128xbf16>
    %cst = arith.constant dense<0.000000e+00> : vector<8x128xf32>
    %3 = tpu.matmul %1, %2, %cst {dimension_numbers = #tpu.dot_dimension_numbers<[1], [0], [0], [1], [0, 0, 1, 1], [], []>} : vector<8x32xbf16>, vector<32x128xbf16>, vector<8x128xf32> -> vector<8x128xf32>
    %c0_3 = arith.constant 0 : index
    %c0_4 = arith.constant 0 : index
    %4 = vector.load %arg4[%c0_3, %c0_4] : memref<8x128xf32, #tpu.memory_space<vmem>>, vector<1x128xf32>
    %5 = vector.broadcast %4 : vector<1x128xf32> to vector<8x128xf32>
    %6 = arith.addf %3, %5 : vector<8x128xf32>
    %cst_5 = arith.constant 0.000000e+00 : f32
    %7 = vector.broadcast %cst_5 : f32 to vector<8x128xf32>
    %8 = arith.maximumf %6, %7 : vector<8x128xf32>
    %9 = arith.truncf %8 : vector<8x128xf32> to vector<8x128xbf16>
    %c0_6 = arith.constant 0 : index
    %c0_7 = arith.constant 0 : index
    %10 = vector.load %arg3[%c0_6, %c0_7] : memref<128x30xbf16, #tpu.memory_space<vmem>>, vector<128x30xbf16>
    %cst_8 = arith.constant dense<0.000000e+00> : vector<8x30xf32>
    %11 = tpu.matmul %9, %10, %cst_8 {dimension_numbers = #tpu.dot_dimension_numbers<[1], [0], [0], [1], [0, 0, 1, 1], [], []>} : vector<8x128xbf16>, vector<128x30xbf16>, vector<8x30xf32> -> vector<8x30xf32>
    %c1 = arith.constant 1 : index
    %c0_9 = arith.constant 0 : index
    %12 = vector.load %arg4[%c1, %c0_9] : memref<8x128xf32, #tpu.memory_space<vmem>>, vector<1x30xf32>
    %13 = vector.broadcast %12 : vector<1x30xf32> to vector<8x30xf32>
    %14 = arith.addf %11, %13 : vector<8x30xf32>
    %15 = arith.truncf %14 : vector<8x30xf32> to vector<8x30xbf16>
    %c0_10 = arith.constant 0 : index
    %c0_11 = arith.constant 0 : index
    %16 = vector.load %arg5[%c0_10, %c0_11] : memref<8x30xbf16, #tpu.memory_space<vmem>>, vector<8x30xbf16>
    tpu.vector_store %arg5[%c0_10, %c0_11], %15 {strides = array<i32>} : memref<8x30xbf16, #tpu.memory_space<vmem>>, vector<8x30xbf16>,
    return
  }
  func.func @transform_0(%arg0: i32) -> (i32, i32) {
    %c0_i32 = arith.constant 0 : i32
    %c0_i32_0 = arith.constant 0 : i32
    return %arg0, %c0_i32 : i32, i32
  }
  func.func @transform_1(%arg0: i32) -> (i32, i32) {
    %c0_i32 = arith.constant 0 : i32
    %c0_i32_0 = arith.constant 0 : i32
    %c0_i32_1 = arith.constant 0 : i32
    return %c0_i32, %c0_i32_0 : i32, i32
  }
  func.func @transform_2(%arg0: i32) -> (i32, i32) {
    %c0_i32 = arith.constant 0 : i32
    %c0_i32_0 = arith.constant 0 : i32
    %c0_i32_1 = arith.constant 0 : i32
    return %c0_i32, %c0_i32_0 : i32, i32
  }
  func.func @transform_3(%arg0: i32) -> (i32, i32) {
    %c0_i32 = arith.constant 0 : i32
    %c0_i32_0 = arith.constant 0 : i32
    %c0_i32_1 = arith.constant 0 : i32
    return %c0_i32, %c0_i32_0 : i32, i32
  }
  func.func @transform_4(%arg0: i32) -> (i32, i32) {
    %c0_i32 = arith.constant 0 : i32
    %c0_i32_0 = arith.constant 0 : i32
    return %arg0, %c0_i32 : i32, i32
  }
}

</mosaic_0001>

<bundles_post_ra>
// kernel: tpu_custom_call.1
= control target key start
LH: loop header
LB: loop body
LE: loop exit
PB: predicated region body
PF: predicated region fallthrough
CT: control target
= control target key end

     0   :  { %v304_v1 = vmov 0.0   ;;  %vm305_vm0 = vmmov 0   ;;  %vm42_vm1 = vcmask 261120   ;;  %s383_s0 = inlined_call_operand.vmem [shape: f32[8,32], index: 0, kind: input, shape index: {}]   ;;  %s384_s1 = inlined_call_operand.vmem [shape: bf16[32,128], index: 1, kind: input, shape index: {}]   ;;  %s385_s2 = inlined_call_operand.vmem [shape: bf16[128,30], index: 2, kind: input, shape index: {}]   ;;  %s386_s3 = inlined_call_operand.vmem [shape: f32[8,128], index: 3, kind: input, shape index: {}]   ;;  %s387_s4 = inlined_call_operand.hbm [shape: bf16[8,30], index: 4, kind: output, shape index: {}]  }
   0x1   :  { %v270_v0 = vld [vmem:[%s384_s1] sm:$0xff]   ;;  %239 = vmatprep.subr.bf16.mxu0 %v304_v1  ;;  %v271_v2 = vld [vmem:[%s384_s1 + $0x8] sm:$0xff]   ;;  %247 = vmatprep.subr.bf16.mxu1 %v304_v1  ;;  %v274_v7 = vld [vmem:[%s385_s2 + $0x10] sm:$0xff]  }
   0x2   :  { %240 = vmatpush3.bf16.msra.mxu0 %v270_v0  ;;  %243 = vmatprep.mubr.msk.bf16.mxu0 %vm305_vm0, %v304_v1  ;;  %v19_v3 = vld [vmem:[%s383_s0] sm:$0xff]  ;;  %v273_v6 = vld [vmem:[%s385_s2 + $0x8] sm:$0xff]  }
   0x3   :  { %241 = vmatprep.subr.bf16.mxu0 %v304_v1  ;;  %v272_v4 = vld [vmem:[%s385_s2] sm:$0xff]   ;;  %263 = vmatprep.mubr.msk.bf16.mxu1 %vm305_vm0, %v304_v1  ;;  %v20_v5 = vpack.c.bf16 %v19_v3, %v19_v3 }
   0x4   :  { %248 = vmatpush3.bf16.msra.mxu1 %v272_v4 }
   0x5   :  { %249 = vmatprep.subr.bf16.mxu1 %v304_v1 }
   0x6   :  { %242 = vmatpush3.bf16.msra.mxu0 %v271_v2 }
   0x8   :  { %250 = vmatpush3.bf16.msra.mxu1 %v273_v6 }
   0x9   :  { %244 = vmatmul.mubr.msk.bf16.vlgmr.msra.gmra.mrb[0].mxu0 %vm42_vm1, %v20_v5  ;;  %251 = vmatprep.subr.bf16.mxu1 %v304_v1 }
   0xa   :  { %9 = vsyncpa [#allocation3], 0  ;;  %v275_v8 = vld [vmem:[%s385_s2 + $0x18] sm:$0xff]   ;;  %v276_v9 = vld [vmem:[%s385_s2 + $0x20] sm:$0xff]   ;;  %s306_s13 = smov [#allocation2]   ;;  %vm198_vm2 = vcmask 240640  }
   0xb   :  { %v277_v10 = vld [vmem:[%s385_s2 + $0x28] sm:$0xff]   ;;  %v278_v11 = vld [vmem:[%s385_s2 + $0x30] sm:$0xff]   ;;  %v279_v12 = vld [vmem:[%s385_s2 + $0x38] sm:$0xff]   ;;  %s206_s2 = sshll.u32 %s306_s13, 4  ;;  %s207_s2 = int_to_ptr.vmem [resolvable:$true] %s206_s2 }
   0xc   :  { %252 = vmatpush3.bf16.msra.mxu1 %v274_v7  ;;  %v214_v13 = vld [vmem:[%s386_s3] ss:$0 sm:$0xff]  ;;  %v218_v21 = vld [vmem:[%s386_s3 + $0x1] ss:$0 sm:$0xff]  ;;  %s280_s14 = scalar_lea.vmem %s207_s2, 64  ;;  %p285_p1 = scmp.lt.s32.totalorder %s207_s2, %s207_s2 }
   0xd   :  { %253 = vmatprep.subr.bf16.mxu1 %v304_v1  ;;  %p281_p0 = scmp.ne.s32.totalorder %s207_s2, %s280_s14  ;;  %p286_p2 = scmp.lt.s32.totalorder %s280_s14, %s280_s14 }
   0xf   :  { %p287_p3 = por %p286_p2, %p285_p1 }
  0x10   :  { %254 = vmatpush3.bf16.msra.mxu1 %v275_v8 }
  0x11   :  { %255 = vmatprep.subr.bf16.mxu1 %v304_v1  ;;  %p288_p4 = pnand %p287_p3, %p281_p0 }
  0x14   :  { %256 = vmatpush3.bf16.msra.mxu1 %v276_v9 }
  0x15   :  { %257 = vmatprep.subr.bf16.mxu1 %v304_v1 }
  0x18   :  { %258 = vmatpush3.bf16.msra.mxu1 %v277_v10 }
  0x19   :  { %259 = vmatprep.subr.bf16.mxu1 %v304_v1 }
  0x1c   :  { %260 = vmatpush3.bf16.msra.mxu1 %v278_v11 }
  0x1d   :  { %261 = vmatprep.subr.bf16.mxu1 %v304_v1 }
  0x20   :  { %262 = vmatpush3.bf16.msra.mxu1 %v279_v12 }
  0xdc   :  { %v80_v14 = vpop.f32.mrb[0].mxu0 }
  0xdd   :  { %v81_v15 = vadd.f32 %v214_v13, %v80_v14  ;;  %v245_v16 = vpop.f32.mrb[1].mxu0 }
  0xde   :  { %v83_v17 = vpop.f32.mrb[2].mxu0 }
  0xdf   :  { %v86_v18 = vmax.f32 %v81_v15, 0.0  ;;  %v246_v19 = vpop.f32.mrb[3].mxu0 }
  0xe1   :  { %v87_v20 = vpack.c.bf16 %v86_v18, %v86_v18 }
  0xe3   :  { %264 = vmatmul.mubr.bf16.vlgmr.msra.gmra.mrb[0].mxu1 %v87_v20 }
 0x1b6   :  { %v191_v22 = vpop.f32.mrb[0].mxu1 }
 0x1b7   :  { %v192_v23 = vadd.f32 %v218_v21, %v191_v22  ;;  %v265_v24 = vpop.f32.mrb[1].mxu1 }
 0x1b8   :  { %v194_v25 = vpop.f32.mrb[2].mxu1 }
 0x1b9   :  { %v197_v26 = vpack.c.bf16 %v192_v23, %v192_v23  ;;  %v266_v27 = vpop.f32.mrb[3].mxu1 }
 0x1bb   :  { %199 = vst.msk [vmem:[#allocation2] sm:$0xf] %vm198_vm2, %v197_v26 }
 0x1bc   :  { %291 = shalt.err (!%p288_p4)
}
 0x1bd   :  { %s292_s16 = scalar_lea.hbm %s387_s4, 64 }
 0x1be   :  { %p293_p5 = scmp.ne.s32.totalorder %s387_s4, %s292_s16  ;;  %p296_p6 = scmp.lt.u32.totalorder %s292_s16, %s387_s4 }
 0x1c0   :  { %p298_p7 = pnand %p296_p6, %p293_p5 }
 0x1c2   :  { %301 = shalt.err (!%p298_p7)
}
 0x1c3   :  { %209 = dma.vmem_to_hbm [thread:$0]  %s207_s2, 64, %s387_s4, [#allocation3]  }
 0x1c4   :  { %302 = dma.done.wait [#allocation3], 64  }
 0x1c5   :  { %303 = vsyncadd [#allocation3], 4294967232 }
 0x1c6   :  { %213 = vsyncpa [#allocation3], 1 }

</bundles_post_ra>
